<compile_context>
chip_gen: v6e
topology: v6e:2x2x1
jax: 0.10.0
libtpu: 0.0.40
codegen_flags: <defaults>
</compile_context>

<pallas_src>
import jax
import jax.numpy as jnp
from jax import lax
from jax.experimental import pallas as pl
from jax.experimental.pallas import tpu as pltpu

# Model hyper-parameters (from the PyTorch module).
VOCAB_SIZE = 10
EMBEDDING_DIM = 4
HIDDEN_SIZE = 4
OUTPUT_SIZE = 1

# Hardware tiling constants.
LANE = 128                  # lanes per vreg
SUB = 8                     # sublanes per vreg

H_PAD = SUB                 # hidden dim padded 4 -> 8 (sublanes)
V_PAD = 2 * SUB             # vocab padded 10 -> 16 (sublanes)
O_PAD = SUB                 # output rows padded 1 -> 8 (sublanes)
HA = 2 * SUB                # augmented hidden rows: [h (8) | ones (1) | zeros (7)]
ONES_ROW = H_PAD            # index of the constant-ones row (folds b_fc into FC matmul)
B_TILE = LANE               # sequences per grid step (lane-dense batch tile)


def _make_rnn2_kernel(T, h_real):
    """Kernel closure over static sequence length T and real hidden size."""

    def kernel(tok_ref, gb_ref, whh_ref, wfc_ref, out_ref, h_all_ref):
        # tok_ref : (1, T*B_TILE) int32, column index = t*B_TILE + b
        # gb_ref  : (H_PAD, V_PAD)   fused  W_ih @ E^T + (b_ih + b_hh), zero-padded
        # whh_ref : (H_PAD, H_PAD)   zero-padded
        # wfc_ref : (O_PAD, HA)      row 0 = [w_fc | 0... | b_fc | 0...]
        # out_ref : (O_PAD, T*B_TILE)
        # h_all   : (HA, T*B_TILE)   scratch; rows 0..7 = h_t, row 8 = 1.0, rest 0
        TB = tok_ref.shape[1]

        # --- fused embedding lookup + input projection + bias: ONE MXU matmul ---
        tok = tok_ref[...]                                            # (1, TB) int32
        vocab_iota = lax.broadcasted_iota(jnp.int32, (V_PAD, TB), 0)  # (V_PAD, TB)
        onehot = (vocab_iota == tok).astype(jnp.float32)              # (V_PAD, TB)
        x_pre = jnp.dot(gb_ref[...], onehot,
                        preferred_element_type=jnp.float32)           # (H_PAD, TB)

        # --- initialize the augmented scratch rows once (ones row folds b_fc) ---
        aug_iota = lax.broadcasted_iota(jnp.int32, (HA - H_PAD, TB), 0)
        h_all_ref[H_PAD:HA, :] = (aug_iota == 0).astype(jnp.float32)  # aligned 8x? store

        # --- recurrence: VPU broadcast-FMAs (no MXU on the serial critical path) ---
        whh = whh_ref[...]                                            # (H_PAD, H_PAD)
        # whh columns lane-broadcast once, hoisted out of the time loop.
        whh_cols = [jnp.broadcast_to(whh[:, j:j + 1], (H_PAD, B_TILE))
                    for j in range(h_real)]

        h = jnp.zeros((H_PAD, B_TILE), jnp.float32)                   # h0 = 0
        for t in range(T):                                            # static unroll
            lo = t * B_TILE                                           # 128-aligned
            rec = whh_cols[0] * h[0:1, :]
            for j in range(1, h_real):
                rec = rec + whh_cols[j] * h[j:j + 1, :]
            h = jnp.tanh(x_pre[:, lo:lo + B_TILE] + rec)              # EUP tanh
            h_all_ref[0:H_PAD, lo:lo + B_TILE] = h                    # full-tile vst

        # --- hoisted FC head (+ bias via ones row): one matmul + one dense store ---
        out_ref[...] = jnp.dot(wfc_ref[...], h_all_ref[...],
                               preferred_element_type=jnp.float32)    # (O_PAD, TB)

    return kernel


def rnn2_forward(tokens, params):
    """tokens: (B, T) int32 ids.  Returns (B, T, OUTPUT_SIZE) float32."""
    B, T = tokens.shape
    G = pl.cdiv(B, B_TILE)               # independent batch groups (grid axis)
    B_padded = G * B_TILE
    TB = T * B_TILE

    emb = params["embedding"].astype(jnp.float32)                 # (V, E)
    w_ih = params["w_ih"].astype(jnp.float32)                     # (H, E)
    w_hh = params["w_hh"].astype(jnp.float32)                     # (H, H)
    bias = (params["b_ih"] + params["b_hh"]).astype(jnp.float32)  # (H,)
    w_fc = params["w_fc"].astype(jnp.float32)                     # (O, H)
    b_fc = params["b_fc"].astype(jnp.float32)                     # (O,)

    V, _ = emb.shape
    H = w_hh.shape[0]
    O = w_fc.shape[0]

    # Fused (H_PAD, V_PAD) table: column v = W_ih @ emb[v] + (b_ih + b_hh).
    gb = jnp.zeros((H_PAD, V_PAD), jnp.float32)
    gb = gb.at[:H, :V].set(w_ih @ emb.T + bias[:, None])

    whh_p = jnp.zeros((H_PAD, H_PAD), jnp.float32).at[:H, :H].set(w_hh)

    # FC weights with b_fc folded in (multiplies the constant-ones scratch row).
    wfc_p = jnp.zeros((O_PAD, HA), jnp.float32)
    wfc_p = wfc_p.at[:O, :H].set(w_fc).at[:O, ONES_ROW].set(b_fc)

    # Tokens: pad batch to a lane-dense multiple of 128 with an id whose fused
    # table column is all-zero (>= V), then lay out group-major / time-major /
    # batch-fast so column index = t*B_TILE + b.
    # Note: out-of-range ids yield an all-zero one-hot column (PyTorch leaves
    # this undefined) -- intentional, only used for padding columns here.
    pad_id = VOCAB_SIZE
    tok = jnp.full((B_padded, T), pad_id, jnp.int32).at[:B].set(
        tokens.astype(jnp.int32))
    tok_groups = tok.reshape(G, B_TILE, T).transpose(0, 2, 1).reshape(G, TB)

    out = pl.pallas_call(
        _make_rnn2_kernel(T, H),
        out_shape=jax.ShapeDtypeStruct((G * O_PAD, TB), jnp.float32),
        grid=(G,),
        in_specs=[
            pl.BlockSpec((1, TB), lambda g: (g, 0)),           # tokens (per group)
            pl.BlockSpec((H_PAD, V_PAD), lambda g: (0, 0)),    # fused table (resident)
            pl.BlockSpec((H_PAD, H_PAD), lambda g: (0, 0)),    # W_hh
            pl.BlockSpec((O_PAD, HA), lambda g: (0, 0)),       # FC weights (+bias)
        ],
        out_specs=pl.BlockSpec((O_PAD, TB), lambda g: (g, 0)),
        scratch_shapes=[pltpu.VMEM((HA, TB), jnp.float32)],    # hidden states + ones row
        compiler_params=pltpu.CompilerParams(
            dimension_semantics=("parallel",)),                # shards groups on v7x TCs
    )(tok_groups, gb, whh_p, wfc_p)

    # (G*O_PAD, TB) -> (B, T, O): keep real output rows / real batch columns.
    out = out.reshape(G, O_PAD, T, B_TILE)[:, :O]              # (G, O, T, B_TILE)
    out = out.transpose(0, 3, 2, 1).reshape(B_padded, T, O)
    return out[:B]


def rnn2_reference(tokens, params):
    """Pure-JAX reference replicating the PyTorch forward semantics."""
    emb = params["embedding"][tokens]                          # (B, T, E)
    B, T, _ = emb.shape
    H = params["w_hh"].shape[0]
    h = jnp.zeros((B, H), jnp.float32)
    outs = []
    for t in range(T):
        h = jnp.tanh(emb[:, t] @ params["w_ih"].T + params["b_ih"]
                     + h @ params["w_hh"].T + params["b_hh"])
        outs.append(h @ params["w_fc"].T + params["b_fc"])
    return jnp.stack(outs, axis=1)                             # (B, T, O)


def init_params(key):
    """Deterministic parameter init (matches PyTorch shapes, not values)."""
    ks = jax.random.split(key, 7)
    inv_sqrt_h = 1.0 / jnp.sqrt(jnp.float32(HIDDEN_SIZE))
    return {
        "embedding": jax.random.normal(ks[0], (VOCAB_SIZE, EMBEDDING_DIM),
                                       jnp.float32),
        "w_ih": jax.random.uniform(ks[1], (HIDDEN_SIZE, EMBEDDING_DIM),
                                   jnp.float32, -inv_sqrt_h, inv_sqrt_h),
        "w_hh": jax.random.uniform(ks[2], (HIDDEN_SIZE, HIDDEN_SIZE),
                                   jnp.float32, -inv_sqrt_h, inv_sqrt_h),
        "b_ih": jax.random.uniform(ks[3], (HIDDEN_SIZE,),
                                   jnp.float32, -inv_sqrt_h, inv_sqrt_h),
        "b_hh": jax.random.uniform(ks[4], (HIDDEN_SIZE,),
                                   jnp.float32, -inv_sqrt_h, inv_sqrt_h),
        "w_fc": jax.random.uniform(ks[5], (OUTPUT_SIZE, HIDDEN_SIZE),
                                   jnp.float32, -inv_sqrt_h, inv_sqrt_h),
        "b_fc": jax.random.uniform(ks[6], (OUTPUT_SIZE,),
                                   jnp.float32, -inv_sqrt_h, inv_sqrt_h),
    }


if __name__ == "__main__":
    key = jax.random.PRNGKey(0)
    k_tok, k_par = jax.random.split(key)

    B, T = 2, 8
    tokens = jax.random.randint(k_tok, (B, T), 0, VOCAB_SIZE, dtype=jnp.int32)
    params = init_params(k_par)

    out = jax.block_until_ready(rnn2_forward(tokens, params))
    ref = rnn2_reference(tokens, params)

    assert out.shape == (B, T, OUTPUT_SIZE), out.shape
    # f32 MXU matmuls use multi-pass bf16 decomposition (~1e-7 rel); 1e-4 is margin.
    assert jnp.allclose(out, ref, atol=1e-4, rtol=1e-4), (
        "mismatch vs reference: max abs err "
        f"{jnp.max(jnp.abs(out - ref))}")

    print("KERNEL_OK")
</pallas_src>

<mosaic_0001>
module attributes {stable_mosaic.version = 11 : i64} {
  func.func @kernel(%arg0: i32, %arg1: memref<1x1024xi32, #tpu.memory_space<vmem>>, %arg2: memref<8x16xf32, #tpu.memory_space<vmem>>, %arg3: memref<8x8xf32, #tpu.memory_space<vmem>>, %arg4: memref<8x16xf32, #tpu.memory_space<vmem>>, %arg5: memref<8x1024xf32, #tpu.memory_space<vmem>>, %arg6: memref<16x1024xf32, #tpu.memory_space<vmem>>) attributes {dimension_semantics = [#tpu.dimension_semantics<parallel>], iteration_bounds = array<i64: 1>, scalar_prefetch = 0 : i64, scratch_operands = 1 : i64, tpu.core_type = #tpu.core_type<tc>, window_params = [{transform_indices = @transform_0, window_bounds = array<i64: 1, 1024>}, {pipeline_mode = #tpu.pipeline_mode<synchronous>, transform_indices = @transform_1, window_bounds = array<i64: 8, 16>}, {pipeline_mode = #tpu.pipeline_mode<synchronous>, transform_indices = @transform_2, window_bounds = array<i64: 8, 8>}, {pipeline_mode = #tpu.pipeline_mode<synchronous>, transform_indices = @transform_3, window_bounds = array<i64: 8, 16>}, {transform_indices = @transform_4, window_bounds = array<i64: 8, 1024>}]} {
    %c0 = arith.constant 0 : index
    %c0_0 = arith.constant 0 : index
    %0 = vector.load %arg1[%c0, %c0_0] : memref<1x1024xi32, #tpu.memory_space<vmem>>, vector<1x1024xi32>
    %1 = tpu.iota {dimensions = array<i32: 0>} : vector<16x1024xi32>
    %2 = vector.broadcast %0 : vector<1x1024xi32> to vector<16x1024xi32>
    %3 = arith.cmpi eq, %1, %2 : vector<16x1024xi32>
    %4 = arith.extui %3 : vector<16x1024xi1> to vector<16x1024xi32>
    %5 = arith.sitofp %4 : vector<16x1024xi32> to vector<16x1024xf32>
    %c0_1 = arith.constant 0 : index
    %c0_2 = arith.constant 0 : index
    %6 = vector.load %arg2[%c0_1, %c0_2] : memref<8x16xf32, #tpu.memory_space<vmem>>, vector<8x16xf32>
    %cst = arith.constant dense<0.000000e+00> : vector<8x1024xf32>
    %7 = tpu.matmul %6, %5, %cst {dimension_numbers = #tpu.dot_dimension_numbers<[1], [0], [0], [1], [0, 0, 1, 1], [], []>} : vector<8x16xf32>, vector<16x1024xf32>, vector<8x1024xf32> -> vector<8x1024xf32>
    %8 = tpu.iota {dimensions = array<i32: 0>} : vector<8x1024xi32>
    %c0_i32 = arith.constant 0 : i32
    %9 = vector.broadcast %c0_i32 : i32 to vector<8x1024xi32>
    %10 = arith.cmpi eq, %8, %9 : vector<8x1024xi32>
    %11 = arith.extui %10 : vector<8x1024xi1> to vector<8x1024xi32>
    %12 = arith.sitofp %11 : vector<8x1024xi32> to vector<8x1024xf32>
    %c8 = arith.constant 8 : index
    %c0_3 = arith.constant 0 : index
    %13 = vector.load %arg6[%c8, %c0_3] : memref<16x1024xf32, #tpu.memory_space<vmem>>, vector<8x1024xf32>
    tpu.vector_store %arg6[%c8, %c0_3], %12 {strides = array<i32>} : memref<16x1024xf32, #tpu.memory_space<vmem>>, vector<8x1024xf32>,
    %c0_4 = arith.constant 0 : index
    %c0_5 = arith.constant 0 : index
    %14 = vector.load %arg3[%c0_4, %c0_5] : memref<8x8xf32, #tpu.memory_space<vmem>>, vector<8x8xf32>
    %15 = vector.extract_strided_slice %14 {offsets = [0, 0], sizes = [8, 1], strides = [1, 1]} : vector<8x8xf32> to vector<8x1xf32>
    %16 = vector.shape_cast %15 : vector<8x1xf32> to vector<8x1xf32>
    %17 = vector.broadcast %16 : vector<8x1xf32> to vector<8x128xf32>
    %18 = vector.extract_strided_slice %14 {offsets = [0, 1], sizes = [8, 1], strides = [1, 1]} : vector<8x8xf32> to vector<8x1xf32>
    %19 = vector.shape_cast %18 : vector<8x1xf32> to vector<8x1xf32>
    %20 = vector.broadcast %19 : vector<8x1xf32> to vector<8x128xf32>
    %21 = vector.extract_strided_slice %14 {offsets = [0, 2], sizes = [8, 1], strides = [1, 1]} : vector<8x8xf32> to vector<8x1xf32>
    %22 = vector.shape_cast %21 : vector<8x1xf32> to vector<8x1xf32>
    %23 = vector.broadcast %22 : vector<8x1xf32> to vector<8x128xf32>
    %24 = vector.extract_strided_slice %14 {offsets = [0, 3], sizes = [8, 1], strides = [1, 1]} : vector<8x8xf32> to vector<8x1xf32>
    %25 = vector.shape_cast %24 : vector<8x1xf32> to vector<8x1xf32>
    %26 = vector.broadcast %25 : vector<8x1xf32> to vector<8x128xf32>
    %cst_6 = arith.constant 0.000000e+00 : f32
    %27 = vector.broadcast %cst_6 : f32 to vector<8x128xf32>
    %28 = vector.extract_strided_slice %27 {offsets = [0, 0], sizes = [1, 128], strides = [1, 1]} : vector<8x128xf32> to vector<1x128xf32>
    %29 = vector.broadcast %28 : vector<1x128xf32> to vector<8x128xf32>
    %30 = arith.mulf %17, %29 : vector<8x128xf32>
    %31 = vector.extract_strided_slice %27 {offsets = [1, 0], sizes = [1, 128], strides = [1, 1]} : vector<8x128xf32> to vector<1x128xf32>
    %32 = vector.broadcast %31 : vector<1x128xf32> to vector<8x128xf32>
    %33 = arith.mulf %20, %32 : vector<8x128xf32>
    %34 = arith.addf %30, %33 : vector<8x128xf32>
    %35 = vector.extract_strided_slice %27 {offsets = [2, 0], sizes = [1, 128], strides = [1, 1]} : vector<8x128xf32> to vector<1x128xf32>
    %36 = vector.broadcast %35 : vector<1x128xf32> to vector<8x128xf32>
    %37 = arith.mulf %23, %36 : vector<8x128xf32>
    %38 = arith.addf %34, %37 : vector<8x128xf32>
    %39 = vector.extract_strided_slice %27 {offsets = [3, 0], sizes = [1, 128], strides = [1, 1]} : vector<8x128xf32> to vector<1x128xf32>
    %40 = vector.broadcast %39 : vector<1x128xf32> to vector<8x128xf32>
    %41 = arith.mulf %26, %40 : vector<8x128xf32>
    %42 = arith.addf %38, %41 : vector<8x128xf32>
    %43 = vector.extract_strided_slice %7 {offsets = [0, 0], sizes = [8, 128], strides = [1, 1]} : vector<8x1024xf32> to vector<8x128xf32>
    %44 = arith.addf %43, %42 : vector<8x128xf32>
    %45 = math.tanh %44 : vector<8x128xf32>
    %c0_7 = arith.constant 0 : index
    %c0_8 = arith.constant 0 : index
    %46 = vector.load %arg6[%c0_7, %c0_8] : memref<16x1024xf32, #tpu.memory_space<vmem>>, vector<8x128xf32>
    tpu.vector_store %arg6[%c0_7, %c0_8], %45 {strides = array<i32>} : memref<16x1024xf32, #tpu.memory_space<vmem>>, vector<8x128xf32>,
    %47 = vector.extract_strided_slice %45 {offsets = [0, 0], sizes = [1, 128], strides = [1, 1]} : vector<8x128xf32> to vector<1x128xf32>
    %48 = vector.broadcast %47 : vector<1x128xf32> to vector<8x128xf32>
    %49 = arith.mulf %17, %48 : vector<8x128xf32>
    %50 = vector.extract_strided_slice %45 {offsets = [1, 0], sizes = [1, 128], strides = [1, 1]} : vector<8x128xf32> to vector<1x128xf32>
    %51 = vector.broadcast %50 : vector<1x128xf32> to vector<8x128xf32>
    %52 = arith.mulf %20, %51 : vector<8x128xf32>
    %53 = arith.addf %49, %52 : vector<8x128xf32>
    %54 = vector.extract_strided_slice %45 {offsets = [2, 0], sizes = [1, 128], strides = [1, 1]} : vector<8x128xf32> to vector<1x128xf32>
    %55 = vector.broadcast %54 : vector<1x128xf32> to vector<8x128xf32>
    %56 = arith.mulf %23, %55 : vector<8x128xf32>
    %57 = arith.addf %53, %56 : vector<8x128xf32>
    %58 = vector.extract_strided_slice %45 {offsets = [3, 0], sizes = [1, 128], strides = [1, 1]} : vector<8x128xf32> to vector<1x128xf32>
    %59 = vector.broadcast %58 : vector<1x128xf32> to vector<8x128xf32>
    %60 = arith.mulf %26, %59 : vector<8x128xf32>
    %61 = arith.addf %57, %60 : vector<8x128xf32>
    %62 = vector.extract_strided_slice %7 {offsets = [0, 128], sizes = [8, 128], strides = [1, 1]} : vector<8x1024xf32> to vector<8x128xf32>
    %63 = arith.addf %62, %61 : vector<8x128xf32>
    %64 = math.tanh %63 : vector<8x128xf32>
    %c0_9 = arith.constant 0 : index
    %c128 = arith.constant 128 : index
    %65 = vector.load %arg6[%c0_9, %c128] : memref<16x1024xf32, #tpu.memory_space<vmem>>, vector<8x128xf32>
    tpu.vector_store %arg6[%c0_9, %c128], %64 {strides = array<i32>} : memref<16x1024xf32, #tpu.memory_space<vmem>>, vector<8x128xf32>,
    %66 = vector.extract_strided_slice %64 {offsets = [0, 0], sizes = [1, 128], strides = [1, 1]} : vector<8x128xf32> to vector<1x128xf32>
    %67 = vector.broadcast %66 : vector<1x128xf32> to vector<8x128xf32>
    %68 = arith.mulf %17, %67 : vector<8x128xf32>
    %69 = vector.extract_strided_slice %64 {offsets = [1, 0], sizes = [1, 128], strides = [1, 1]} : vector<8x128xf32> to vector<1x128xf32>
    %70 = vector.broadcast %69 : vector<1x128xf32> to vector<8x128xf32>
    %71 = arith.mulf %20, %70 : vector<8x128xf32>
    %72 = arith.addf %68, %71 : vector<8x128xf32>
    %73 = vector.extract_strided_slice %64 {offsets = [2, 0], sizes = [1, 128], strides = [1, 1]} : vector<8x128xf32> to vector<1x128xf32>
    %74 = vector.broadcast %73 : vector<1x128xf32> to vector<8x128xf32>
    %75 = arith.mulf %23, %74 : vector<8x128xf32>
    %76 = arith.addf %72, %75 : vector<8x128xf32>
    %77 = vector.extract_strided_slice %64 {offsets = [3, 0], sizes = [1, 128], strides = [1, 1]} : vector<8x128xf32> to vector<1x128xf32>
    %78 = vector.broadcast %77 : vector<1x128xf32> to vector<8x128xf32>
    %79 = arith.mulf %26, %78 : vector<8x128xf32>
    %80 = arith.addf %76, %79 : vector<8x128xf32>
    %81 = vector.extract_strided_slice %7 {offsets = [0, 256], sizes = [8, 128], strides = [1, 1]} : vector<8x1024xf32> to vector<8x128xf32>
    %82 = arith.addf %81, %80 : vector<8x128xf32>
    %83 = math.tanh %82 : vector<8x128xf32>
    %c0_10 = arith.constant 0 : index
    %c256 = arith.constant 256 : index
    %84 = vector.load %arg6[%c0_10, %c256] : memref<16x1024xf32, #tpu.memory_space<vmem>>, vector<8x128xf32>
    tpu.vector_store %arg6[%c0_10, %c256], %83 {strides = array<i32>} : memref<16x1024xf32, #tpu.memory_space<vmem>>, vector<8x128xf32>,
    %85 = vector.extract_strided_slice %83 {offsets = [0, 0], sizes = [1, 128], strides = [1, 1]} : vector<8x128xf32> to vector<1x128xf32>
    %86 = vector.broadcast %85 : vector<1x128xf32> to vector<8x128xf32>
    %87 = arith.mulf %17, %86 : vector<8x128xf32>
    %88 = vector.extract_strided_slice %83 {offsets = [1, 0], sizes = [1, 128], strides = [1, 1]} : vector<8x128xf32> to vector<1x128xf32>
    %89 = vector.broadcast %88 : vector<1x128xf32> to vector<8x128xf32>
    %90 = arith.mulf %20, %89 : vector<8x128xf32>
    %91 = arith.addf %87, %90 : vector<8x128xf32>
    %92 = vector.extract_strided_slice %83 {offsets = [2, 0], sizes = [1, 128], strides = [1, 1]} : vector<8x128xf32> to vector<1x128xf32>
    %93 = vector.broadcast %92 : vector<1x128xf32> to vector<8x128xf32>
    %94 = arith.mulf %23, %93 : vector<8x128xf32>
    %95 = arith.addf %91, %94 : vector<8x128xf32>
    %96 = vector.extract_strided_slice %83 {offsets = [3, 0], sizes = [1, 128], strides = [1, 1]} : vector<8x128xf32> to vector<1x128xf32>
    %97 = vector.broadcast %96 : vector<1x128xf32> to vector<8x128xf32>
    %98 = arith.mulf %26, %97 : vector<8x128xf32>
    %99 = arith.addf %95, %98 : vector<8x128xf32>
    %100 = vector.extract_strided_slice %7 {offsets = [0, 384], sizes = [8, 128], strides = [1, 1]} : vector<8x1024xf32> to vector<8x128xf32>
    %101 = arith.addf %100, %99 : vector<8x128xf32>
    %102 = math.tanh %101 : vector<8x128xf32>
    %c0_11 = arith.constant 0 : index
    %c384 = arith.constant 384 : index
    %103 = vector.load %arg6[%c0_11, %c384] : memref<16x1024xf32, #tpu.memory_space<vmem>>, vector<8x128xf32>
    tpu.vector_store %arg6[%c0_11, %c384], %102 {strides = array<i32>} : memref<16x1024xf32, #tpu.memory_space<vmem>>, vector<8x128xf32>,
    %104 = vector.extract_strided_slice %102 {offsets = [0, 0], sizes = [1, 128], strides = [1, 1]} : vector<8x128xf32> to vector<1x128xf32>
    %105 = vector.broadcast %104 : vector<1x128xf32> to vector<8x128xf32>
    %106 = arith.mulf %17, %105 : vector<8x128xf32>
    %107 = vector.extract_strided_slice %102 {offsets = [1, 0], sizes = [1, 128], strides = [1, 1]} : vector<8x128xf32> to vector<1x128xf32>
    %108 = vector.broadcast %107 : vector<1x128xf32> to vector<8x128xf32>
    %109 = arith.mulf %20, %108 : vector<8x128xf32>
    %110 = arith.addf %106, %109 : vector<8x128xf32>
    %111 = vector.extract_strided_slice %102 {offsets = [2, 0], sizes = [1, 128], strides = [1, 1]} : vector<8x128xf32> to vector<1x128xf32>
    %112 = vector.broadcast %111 : vector<1x128xf32> to vector<8x128xf32>
    %113 = arith.mulf %23, %112 : vector<8x128xf32>
    %114 = arith.addf %110, %113 : vector<8x128xf32>
    %115 = vector.extract_strided_slice %102 {offsets = [3, 0], sizes = [1, 128], strides = [1, 1]} : vector<8x128xf32> to vector<1x128xf32>
    %116 = vector.broadcast %115 : vector<1x128xf32> to vector<8x128xf32>
    %117 = arith.mulf %26, %116 : vector<8x128xf32>
    %118 = arith.addf %114, %117 : vector<8x128xf32>
    %119 = vector.extract_strided_slice %7 {offsets = [0, 512], sizes = [8, 128], strides = [1, 1]} : vector<8x1024xf32> to vector<8x128xf32>
    %120 = arith.addf %119, %118 : vector<8x128xf32>
    %121 = math.tanh %120 : vector<8x128xf32>
    %c0_12 = arith.constant 0 : index
    %c512 = arith.constant 512 : index
    %122 = vector.load %arg6[%c0_12, %c512] : memref<16x1024xf32, #tpu.memory_space<vmem>>, vector<8x128xf32>
    tpu.vector_store %arg6[%c0_12, %c512], %121 {strides = array<i32>} : memref<16x1024xf32, #tpu.memory_space<vmem>>, vector<8x128xf32>,
    %123 = vector.extract_strided_slice %121 {offsets = [0, 0], sizes = [1, 128], strides = [1, 1]} : vector<8x128xf32> to vector<1x128xf32>
    %124 = vector.broadcast %123 : vector<1x128xf32> to vector<8x128xf32>
    %125 = arith.mulf %17, %124 : vector<8x128xf32>
    %126 = vector.extract_strided_slice %121 {offsets = [1, 0], sizes = [1, 128], strides = [1, 1]} : vector<8x128xf32> to vector<1x128xf32>
    %127 = vector.broadcast %126 : vector<1x128xf32> to vector<8x128xf32>
    %128 = arith.mulf %20, %127 : vector<8x128xf32>
    %129 = arith.addf %125, %128 : vector<8x128xf32>
    %130 = vector.extract_strided_slice %121 {offsets = [2, 0], sizes = [1, 128], strides = [1, 1]} : vector<8x128xf32> to vector<1x128xf32>
    %131 = vector.broadcast %130 : vector<1x128xf32> to vector<8x128xf32>
    %132 = arith.mulf %23, %131 : vector<8x128xf32>
    %133 = arith.addf %129, %132 : vector<8x128xf32>
    %134 = vector.extract_strided_slice %121 {offsets = [3, 0], sizes = [1, 128], strides = [1, 1]} : vector<8x128xf32> to vector<1x128xf32>
    %135 = vector.broadcast %134 : vector<1x128xf32> to vector<8x128xf32>
    %136 = arith.mulf %26, %135 : vector<8x128xf32>
    %137 = arith.addf %133, %136 : vector<8x128xf32>
    %138 = vector.extract_strided_slice %7 {offsets = [0, 640], sizes = [8, 128], strides = [1, 1]} : vector<8x1024xf32> to vector<8x128xf32>
    %139 = arith.addf %138, %137 : vector<8x128xf32>
    %140 = math.tanh %139 : vector<8x128xf32>
    %c0_13 = arith.constant 0 : index
    %c640 = arith.constant 640 : index
    %141 = vector.load %arg6[%c0_13, %c640] : memref<16x1024xf32, #tpu.memory_space<vmem>>, vector<8x128xf32>
    tpu.vector_store %arg6[%c0_13, %c640], %140 {strides = array<i32>} : memref<16x1024xf32, #tpu.memory_space<vmem>>, vector<8x128xf32>,
    %142 = vector.extract_strided_slice %140 {offsets = [0, 0], sizes = [1, 128], strides = [1, 1]} : vector<8x128xf32> to vector<1x128xf32>
    %143 = vector.broadcast %142 : vector<1x128xf32> to vector<8x128xf32>
    %144 = arith.mulf %17, %143 : vector<8x128xf32>
    %145 = vector.extract_strided_slice %140 {offsets = [1, 0], sizes = [1, 128], strides = [1, 1]} : vector<8x128xf32> to vector<1x128xf32>
    %146 = vector.broadcast %145 : vector<1x128xf32> to vector<8x128xf32>
    %147 = arith.mulf %20, %146 : vector<8x128xf32>
    %148 = arith.addf %144, %147 : vector<8x128xf32>
    %149 = vector.extract_strided_slice %140 {offsets = [2, 0], sizes = [1, 128], strides = [1, 1]} : vector<8x128xf32> to vector<1x128xf32>
    %150 = vector.broadcast %149 : vector<1x128xf32> to vector<8x128xf32>
    %151 = arith.mulf %23, %150 : vector<8x128xf32>
    %152 = arith.addf %148, %151 : vector<8x128xf32>
    %153 = vector.extract_strided_slice %140 {offsets = [3, 0], sizes = [1, 128], strides = [1, 1]} : vector<8x128xf32> to vector<1x128xf32>
    %154 = vector.broadcast %153 : vector<1x128xf32> to vector<8x128xf32>
    %155 = arith.mulf %26, %154 : vector<8x128xf32>
    %156 = arith.addf %152, %155 : vector<8x128xf32>
    %157 = vector.extract_strided_slice %7 {offsets = [0, 768], sizes = [8, 128], strides = [1, 1]} : vector<8x1024xf32> to vector<8x128xf32>
    %158 = arith.addf %157, %156 : vector<8x128xf32>
    %159 = math.tanh %158 : vector<8x128xf32>
    %c0_14 = arith.constant 0 : index
    %c768 = arith.constant 768 : index
    %160 = vector.load %arg6[%c0_14, %c768] : memref<16x1024xf32, #tpu.memory_space<vmem>>, vector<8x128xf32>
    tpu.vector_store %arg6[%c0_14, %c768], %159 {strides = array<i32>} : memref<16x1024xf32, #tpu.memory_space<vmem>>, vector<8x128xf32>,
    %161 = vector.extract_strided_slice %159 {offsets = [0, 0], sizes = [1, 128], strides = [1, 1]} : vector<8x128xf32> to vector<1x128xf32>
    %162 = vector.broadcast %161 : vector<1x128xf32> to vector<8x128xf32>
    %163 = arith.mulf %17, %162 : vector<8x128xf32>
    %164 = vector.extract_strided_slice %159 {offsets = [1, 0], sizes = [1, 128], strides = [1, 1]} : vector<8x128xf32> to vector<1x128xf32>
    %165 = vector.broadcast %164 : vector<1x128xf32> to vector<8x128xf32>
    %166 = arith.mulf %20, %165 : vector<8x128xf32>
    %167 = arith.addf %163, %166 : vector<8x128xf32>
    %168 = vector.extract_strided_slice %159 {offsets = [2, 0], sizes = [1, 128], strides = [1, 1]} : vector<8x128xf32> to vector<1x128xf32>
    %169 = vector.broadcast %168 : vector<1x128xf32> to vector<8x128xf32>
    %170 = arith.mulf %23, %169 : vector<8x128xf32>
    %171 = arith.addf %167, %170 : vector<8x128xf32>
    %172 = vector.extract_strided_slice %159 {offsets = [3, 0], sizes = [1, 128], strides = [1, 1]} : vector<8x128xf32> to vector<1x128xf32>
    %173 = vector.broadcast %172 : vector<1x128xf32> to vector<8x128xf32>
    %174 = arith.mulf %26, %173 : vector<8x128xf32>
    %175 = arith.addf %171, %174 : vector<8x128xf32>
    %176 = vector.extract_strided_slice %7 {offsets = [0, 896], sizes = [8, 128], strides = [1, 1]} : vector<8x1024xf32> to vector<8x128xf32>
    %177 = arith.addf %176, %175 : vector<8x128xf32>
    %178 = math.tanh %177 : vector<8x128xf32>
    %c0_15 = arith.constant 0 : index
    %c896 = arith.constant 896 : index
    %179 = vector.load %arg6[%c0_15, %c896] : memref<16x1024xf32, #tpu.memory_space<vmem>>, vector<8x128xf32>
    tpu.vector_store %arg6[%c0_15, %c896], %178 {strides = array<i32>} : memref<16x1024xf32, #tpu.memory_space<vmem>>, vector<8x128xf32>,
    %c0_16 = arith.constant 0 : index
    %c0_17 = arith.constant 0 : index
    %180 = vector.load %arg4[%c0_16, %c0_17] : memref<8x16xf32, #tpu.memory_space<vmem>>, vector<8x16xf32>
    %c0_18 = arith.constant 0 : index
    %c0_19 = arith.constant 0 : index
    %181 = vector.load %arg6[%c0_18, %c0_19] : memref<16x1024xf32, #tpu.memory_space<vmem>>, vector<16x1024xf32>
    %cst_20 = arith.constant dense<0.000000e+00> : vector<8x1024xf32>
    %182 = tpu.matmul %180, %181, %cst_20 {dimension_numbers = #tpu.dot_dimension_numbers<[1], [0], [0], [1], [0, 0, 1, 1], [], []>} : vector<8x16xf32>, vector<16x1024xf32>, vector<8x1024xf32> -> vector<8x1024xf32>
    %c0_21 = arith.constant 0 : index
    %c0_22 = arith.constant 0 : index
    %183 = vector.load %arg5[%c0_21, %c0_22] : memref<8x1024xf32, #tpu.memory_space<vmem>>, vector<8x1024xf32>
    tpu.vector_store %arg5[%c0_21, %c0_22], %182 {strides = array<i32>} : memref<8x1024xf32, #tpu.memory_space<vmem>>, vector<8x1024xf32>,
    return
  }
  func.func @transform_0(%arg0: i32) -> (i32, i32) {
    %c0_i32 = arith.constant 0 : i32
    %c0_i32_0 = arith.constant 0 : i32
    return %arg0, %c0_i32 : i32, i32
  }
  func.func @transform_1(%arg0: i32) -> (i32, i32) {
    %c0_i32 = arith.constant 0 : i32
    %c0_i32_0 = arith.constant 0 : i32
    %c0_i32_1 = arith.constant 0 : i32
    return %c0_i32, %c0_i32_0 : i32, i32
  }
  func.func @transform_2(%arg0: i32) -> (i32, i32) {
    %c0_i32 = arith.constant 0 : i32
    %c0_i32_0 = arith.constant 0 : i32
    %c0_i32_1 = arith.constant 0 : i32
    return %c0_i32, %c0_i32_0 : i32, i32
  }
  func.func @transform_3(%arg0: i32) -> (i32, i32) {
    %c0_i32 = arith.constant 0 : i32
    %c0_i32_0 = arith.constant 0 : i32
    %c0_i32_1 = arith.constant 0 : i32
    return %c0_i32, %c0_i32_0 : i32, i32
  }
  func.func @transform_4(%arg0: i32) -> (i32, i32) {
    %c0_i32 = arith.constant 0 : i32
    %c0_i32_0 = arith.constant 0 : i32
    return %arg0, %c0_i32 : i32, i32
  }
}

</mosaic_0001>

<bundles_post_ra>
// kernel: tpu_custom_call.1
= control target key start
LH: loop header
LB: loop body
LE: loop exit
PB: predicated region body
PF: predicated region fallthrough
CT: control target
= control target key end

     0   :  { %9 = vsyncpa [#allocation4], 0  ;;  %s1390_s0 = inlined_call_operand.hbm [shape: s32[1,1024], index: 0, kind: input, shape index: {}]   ;;  %s1391_s1 = inlined_call_operand.hbm [shape: f32[8,16], index: 1, kind: input, shape index: {}]   ;;  %s1392_s2 = inlined_call_operand.hbm [shape: f32[8,8], index: 2, kind: input, shape index: {}]   ;;  %s1393_s3 = inlined_call_operand.hbm [shape: f32[8,16], index: 3, kind: input, shape index: {}]   ;;  %s1394_s4 = inlined_call_operand.hbm [shape: f32[8,1024], index: 4, kind: output, shape index: {}]  }
   0x1   :  { %10 = vsyncpa [#allocation7], 0 }
   0x2   :  { %11 = vsyncpa [#allocation10], 0 }
   0x3   :  { %12 = vsyncpa [#allocation5], 0  ;;  %s1177_s15 = smov [#allocation6]   ;;  %s1178_s17 = smov [#allocation3]  }
   0x4   :  { %s29_s16 = sshll.u32 %s1177_s15, 4  ;;  %s19_s18 = sshll.u32 %s1178_s17, 4  ;;  %s30_s16 = int_to_ptr.vmem [resolvable:$true] %s29_s16  ;;  %s20_s18 = int_to_ptr.vmem [resolvable:$true] %s19_s18 }
   0x5   :  { %s1077_s19 = scalar_lea.vmem %s30_s16, 128  ;;  %p1082_p1 = scmp.lt.s32.totalorder %s30_s16, %s30_s16 }
   0x6   :  { %p1078_p0 = scmp.ne.s32.totalorder %s30_s16, %s1077_s19  ;;  %p1083_p2 = scmp.lt.s32.totalorder %s1077_s19, %s1077_s19 }
   0x8   :  { %p1084_p3 = por %p1083_p2, %p1082_p1 }
   0xa   :  { %p1085_p4 = pnand %p1084_p3, %p1078_p0 }
   0xc   :  { %1088 = shalt.err (!%p1085_p4)
}
   0xd   :  { %32 = dma.hbm_to_vmem [thread:$0]  %s1391_s1, 128, %s30_s16, [#allocation7]  }
   0xe   :  { %s1097_s22 = scalar_lea.vmem %s20_s18, 128  ;;  %p1102_p6 = scmp.lt.s32.totalorder %s20_s18, %s20_s18 }
   0xf   :  { %p1098_p5 = scmp.ne.s32.totalorder %s20_s18, %s1097_s22  ;;  %p1103_p7 = scmp.lt.s32.totalorder %s1097_s22, %s1097_s22 }
  0x11   :  { %p1104_p8 = por %p1103_p7, %p1102_p6 }
  0x13   :  { %p1105_p9 = pnand %p1104_p8, %p1098_p5 }
  0x15   :  { %1108 = shalt.err (!%p1105_p9)
}
  0x16   :  { %22 = dma.hbm_to_vmem [thread:$0]  %s1390_s0, 128, %s20_s18, [#allocation4]  }
  0x17   :  { %s1179_s25 = smov [#allocation8]   ;;  %s1180_s27 = smov [#allocation9]  }
  0x18   :  { %s39_s26 = sshll.u32 %s1179_s25, 4  ;;  %s49_s28 = sshll.u32 %s1180_s27, 4  ;;  %s40_s26 = int_to_ptr.vmem [resolvable:$true] %s39_s26  ;;  %s50_s28 = int_to_ptr.vmem [resolvable:$true] %s49_s28 }
  0x19   :  { %s1117_s29 = scalar_lea.vmem %s40_s26, 128  ;;  %p1122_p11 = scmp.lt.s32.totalorder %s40_s26, %s40_s26 }
  0x1a   :  { %p1118_p10 = scmp.ne.s32.totalorder %s40_s26, %s1117_s29  ;;  %p1123_p12 = scmp.lt.s32.totalorder %s1117_s29, %s1117_s29 }
  0x1c   :  { %p1124_p13 = por %p1123_p12, %p1122_p11 }
  0x1e   :  { %p1125_p0 = pnand %p1124_p13, %p1118_p10 }
  0x20   :  { %1128 = shalt.err (!%p1125_p0)
}
  0x21   :  { %42 = dma.hbm_to_vmem [thread:$0]  %s1392_s2, 128, %s40_s26, [#allocation7]  }
  0x22   :  { %s1137_s5 = scalar_lea.vmem %s50_s28, 128  ;;  %p1142_p2 = scmp.lt.s32.totalorder %s50_s28, %s50_s28 }
  0x23   :  { %p1138_p1 = scmp.ne.s32.totalorder %s50_s28, %s1137_s5  ;;  %p1143_p3 = scmp.lt.s32.totalorder %s1137_s5, %s1137_s5 }
  0x25   :  { %p1144_p4 = por %p1143_p3, %p1142_p2 }
  0x27   :  { %p1145_p5 = pnand %p1144_p4, %p1138_p1 }
  0x29   :  { %1148 = shalt.err (!%p1145_p5)
}
  0x2a   :  { %52 = dma.hbm_to_vmem [thread:$0]  %s1393_s3, 128, %s50_s28, [#allocation10]  }
  0x2b   :  { %1169 = dma.done.wait [#allocation4], 128  }
  0x2c   :  { %1170 = vsyncadd [#allocation4], 4294967168 }
  0x2d   :  { %1171 = dma.done.wait [#allocation7], 256  }
  0x2e   :  { %1172 = vsyncadd [#allocation7], 4294967040 }
  0x2f   :  { %1173 = dma.done.wait [#allocation10], 128  }
  0x30   :  { %1174 = vsyncadd [#allocation10], 4294967168  ;;  %v66_v0 = vlaneseq  ;;  %v1181_v1 = vmov 0.0   ;;  %v1182_v3 = vmov 0   ;;  %v1183_v4 = vmov 2   ;;  %v65_v11 = vld [vmem:[#allocation3] sm:$0xff] }
  0x31   :  { %218 = vmatprep.mubr.f32.mxu0 %v1181_v1  ;;  %289 = vmatprep.mubr.f32.mxu1 %v1181_v1  ;;  %v449_v12 = vld [vmem:[#allocation8] sm:$0xff]  ;;  %v1184_v21 = vmov 1.0   ;;  %v149_v22 = vld [vmem:[#allocation6] sm:$0xff]  ;;  %vm150_vm7 = vcmask 130048   ;;  %v1185_v26 = vmov 1   ;;  %v1186_v27 = vmov 3  }
  0x32   :  { %v1227_v2 = vshrl.u32 %v66_v0, 7  ;;  %1048 = vset.pattern.permute.xlu0 %v1182_v3  ;;  %1050 = vset.pattern.permute.xlu1 %v1183_v4  ;;  %v1318_v59 = vld [vmem:[#allocation9] sm:$0xff]  ;;  %s1187_s2 = smov [#allocation11]  }
  0x33   :  { %452 = vperm.xlu0 %1048, %v449_v12   ;;  %460 = vperm.xlu1 %1050, %v449_v12   ;;  %s977_s3 = sshll.u32 %s1187_s2, 4  ;;  %s978_s3 = int_to_ptr.vmem [resolvable:$true] %s977_s3 }
  0x34   :  { %v1230_v5 = vsub.s32 1, %v1227_v2  ;;  %v1233_v6 = vsub.s32 0, %v1227_v2  ;;  %v1236_v7 = vsub.s32 3, %v1227_v2  ;;  %v1239_v8 = vsub.s32 2, %v1227_v2  ;;  %s1149_s7 = scalar_lea.vmem %s978_s3, 1024  ;;  %p1154_p7 = scmp.lt.s32.totalorder %s978_s3, %s978_s3 }
  0x35   :  { %v68_v9 = vadd.s32 8, %v1227_v2  ;;  %v91_v10 = vsub.s32 5, %v1227_v2  ;;  %v87_v13 = vsub.s32 4, %v1227_v2  ;;  %v99_v18 = vsub.s32 7, %v1227_v2  ;;  %p1150_p6 = scmp.ne.s32.totalorder %s978_s3, %s1149_s7  ;;  %p1155_p8 = scmp.lt.s32.totalorder %s1149_s7, %s1149_s7 }
  0x36   :  { %v76_v14 = vrot.slane %v65_v11, %v1230_v5  ;;  %v72_v15 = vrot.slane %v65_v11, %v1233_v6  ;;  %v84_v16 = vrot.slane %v65_v11, %v1236_v7  ;;  %v80_v17 = vrot.slane %v65_v11, %v1239_v8 }
  0x37   :  { %v95_v19 = vsub.s32 6, %v1227_v2  ;;  %v92_v20 = vrot.slane %v65_v11, %v91_v10  ;;  %v88_v23 = vrot.slane %v65_v11, %v87_v13  ;;  %v100_v24 = vrot.slane %v65_v11, %v99_v18  ;;  %1049 = vset.pattern.permute.xlu0 %v1185_v26  ;;  %1051 = vset.pattern.permute.xlu1 %v1186_v27  ;;  %p1156_p9 = por %p1155_p8, %p1154_p7 }
  0x38   :  { %vm110_vm0 = vcmp.eq.s32.totalorder %v68_v9, %v76_v14  ;;  %vm109_vm1 = vcmp.eq.s32.totalorder %v68_v9, %v72_v15  ;;  %vm102_vm2 = vcmp.eq.s32.totalorder %v1227_v2, %v76_v14  ;;  %vm101_vm3 = vcmp.eq.s32.totalorder %v1227_v2, %v72_v15  ;;  %456 = vperm.xlu0 %1049, %v449_v12  }
  0x39   :  { %1004 = vmatprep.subr.msk.mxu0 %vm110_vm0, %v1184_v21  ;;  %vm112_vm4 = vcmp.eq.s32.totalorder %v68_v9, %v84_v16  ;;  %vm111_vm5 = vcmp.eq.s32.totalorder %v68_v9, %v80_v17  ;;  %vm104_vm6 = vcmp.eq.s32.totalorder %v1227_v2, %v84_v16  ;;  %vm103_vm8 = vcmp.eq.s32.totalorder %v1227_v2, %v80_v17  ;;  %p1157_p10 = pnand %p1156_p9, %p1150_p6 }
  0x3a   :  { %1005 = vmatpush1.msk.msra.mxu0 %vm109_vm1, %v1184_v21  ;;  %1009 = vmatprep.subr.msk.mxu1 %vm112_vm4, %v1184_v21  ;;  %v96_v25 = vrot.slane %v65_v11, %v95_v19  ;;  %vm114_vm9 = vcmp.eq.s32.totalorder %v68_v9, %v92_v20  ;;  %vm113_vm10 = vcmp.eq.s32.totalorder %v68_v9, %v88_v23  ;;  %vm438_vm1 = vcmp.eq.s32.totalorder %v1227_v2, 0 }
  0x3b   :  { %1006 = vmatprep.subr.msk.mxu0 %vm102_vm2, %v1184_v21  ;;  %1010 = vmatpush1.msk.msra.mxu1 %vm111_vm5, %v1184_v21  ;;  %vm106_vm11 = vcmp.eq.s32.totalorder %v1227_v2, %v92_v20  ;;  %vm116_vm12 = vcmp.eq.s32.totalorder %v68_v9, %v100_v24  ;;  %vm105_vm13 = vcmp.eq.s32.totalorder %v1227_v2, %v88_v23 }
  0x3c   :  { %1007 = vmatpush1.msk.msra.mxu0 %vm101_vm3, %v1184_v21  ;;  %1011 = vmatprep.subr.msk.mxu1 %vm104_vm6, %v1184_v21  ;;  %vm115_vm14 = vcmp.eq.s32.totalorder %v68_v9, %v96_v25  ;;  %vm108_vm15 = vcmp.eq.s32.totalorder %v1227_v2, %v100_v24  ;;  %vm107_vm0 = vcmp.eq.s32.totalorder %v1227_v2, %v96_v25 }
  0x3d   :  { %1008 = vmatmul.mubr.msk.f32.vlgmr.msra.gmra.mxu0 %vm150_vm7, %v149_v22  ;;  %1012 = vmatpush1.msk.msra.mxu1 %vm103_vm8, %v1184_v21 }
  0x3e   :  { %1013 = vmatmul.mubr.msk.f32.vlgmr.msra.gmra.mxu1 %vm150_vm7, %v149_v22  ;;  %464 = vperm.xlu1 %1051, %v449_v12  }
  0x3f   :  { %1014 = vmatprep.subr.msk.mxu0 %vm114_vm9, %v1184_v21  ;;  %360 = vmatprep.mubr.f32.mxu0 %v1181_v1 }
  0x40   :  { %1015 = vmatpush1.msk.msra.mxu0 %vm113_vm10, %v1184_v21  ;;  %1019 = vmatprep.subr.msk.mxu1 %vm116_vm12, %v1184_v21 }
  0x41   :  { %1016 = vmatprep.subr.msk.mxu0 %vm106_vm11, %v1184_v21  ;;  %1020 = vmatpush1.msk.msra.mxu1 %vm115_vm14, %v1184_v21 }
  0x42   :  { %1017 = vmatpush1.msk.msra.mxu0 %vm105_vm13, %v1184_v21  ;;  %1021 = vmatprep.subr.msk.mxu1 %vm108_vm15, %v1184_v21 }
  0x43   :  { %1018 = vmatmul.mubr.msk.f32.vlgmr.msra.gmra.mxu0 %vm150_vm7, %v149_v22  ;;  %1022 = vmatpush1.msk.msra.mxu1 %vm107_vm0, %v1184_v21 }
  0x44   :  { %431 = vmatprep.mubr.f32.mxu1 %v1181_v1  ;;  %743 = vmatprep.mubr.f32.mxu0 %v1181_v1 }
  0x45   :  { %1023 = vmatmul.mubr.msk.f32.vlgmr.msra.gmra.mxu1 %vm150_vm7, %v149_v22  ;;  %1052 = vset.pattern.permute.xlu0 %v1186_v27 }
  0x46   :  { %814 = vmatprep.mubr.f32.mxu1 %v1181_v1  ;;  %1029 = vmatprep.subr.msk.mxu0 %vm438_vm1, %v1184_v21 }
  0x47   :  { %1031 = vmatprep.subr.msk.mxu1 %vm438_vm1, %v1184_v21  ;;  %1030 = vmatpush1.msk.msra.mxu0 %vm438_vm1, %v1184_v21 }
  0x48   :  { %1032 = vmatpush1.msk.msra.mxu1 %vm438_vm1, %v1184_v21 }
  0xae   :  { %v1295_v28 = vpop.permute.xlu0 %452  ;;  %v1299_v30 = vpop.permute.xlu1 %460 }
  0xaf   :  { %v467_v31 = vmul.f32 0.0, %v1295_v28  ;;  %v470_v34 = vmul.f32 0.0, %v1299_v30 }
  0xb3   :  { %v1297_v29 = vpop.permute.xlu0 %456 }
  0xb4   :  { %v468_v32 = vmul.f32 0.0, %v1297_v29 }
  0xb6   :  { %v469_v33 = vadd.f32 %v468_v32, %v467_v31 }
  0xb8   :  { %v471_v36 = vadd.f32 %v470_v34, %v469_v33 }
  0xb9   :  { %v1304_v35 = vpop.permute.xlu1 %464 }
  0xba   :  { %v472_v37 = vmul.f32 0.0, %v1304_v35 }
  0xbc   :  { %v473_v38 = vadd.f32 %v472_v37, %v471_v36 }
  0xfd   :  { %v220_v39 = vpop.f32.mrf.mxu0 }
  0xfe   :  { %v474_v40 = vadd.f32 %v473_v38, %v220_v39  ;;  %v291_v10 = vpop.f32.mrf.mxu1 }
  0xff   :  { %v222_v53 = vpop.f32.mrf.mxu0 }
 0x100   :  { %1053 = vtanh.f32 %v474_v40  ;;  %v293_v25 = vpop.f32.mrf.mxu1 }
 0x10d   :  { %v1054_v41 = vpop.eup %1053 }
 0x10e   :  { %v480_v42 = vrot.slane %v1054_v41, %v1233_v6  ;;  %v485_v43 = vrot.slane %v1054_v41, %v1230_v5  ;;  %v491_v44 = vrot.slane %v1054_v41, %v1239_v8  ;;  %v497_v47 = vrot.slane %v1054_v41, %v1236_v7 }
 0x110   :  { %v481_v45 = vmul.f32 %v480_v42, %v1295_v28  ;;  %v486_v46 = vmul.f32 %v485_v43, %v1297_v29  ;;  %v492_v49 = vmul.f32 %v491_v44, %v1299_v30  ;;  %v498_v51 = vmul.f32 %v497_v47, %v1304_v35  ;;  %v362_v43 = vpop.f32.mrf.mxu0 }
 0x112   :  { %v487_v48 = vadd.f32 %v486_v46, %v481_v45 }
 0x114   :  { %v493_v50 = vadd.f32 %v492_v49, %v487_v48 }
 0x116   :  { %v499_v52 = vadd.f32 %v498_v51, %v493_v50 }
 0x118   :  { %v500_v54 = vadd.f32 %v499_v52, %v222_v53 }
 0x11a   :  { %1055 = vtanh.f32 %v500_v54  ;;  %v364_v54 = vpop.f32.mrf.mxu0 }
 0x127   :  { %v1056_v55 = vpop.eup %1055 }
 0x128   :  { %709 = vmatprep.subr.mxu0 %v1056_v55  ;;  %v506_v56 = vrot.slane %v1056_v55, %v1233_v6  ;;  %v511_v57 = vrot.slane %v1056_v55, %v1230_v5  ;;  %v517_v58 = vrot.slane %v1056_v55, %v1239_v8  ;;  %v523_v62 = vrot.slane %v1056_v55, %v1236_v7 }
 0x129   :  { %710 = vmatpush1.msra.mxu0 %v1054_v41 }
 0x12a   :  { %v507_v60 = vmul.f32 %v506_v56, %v1295_v28  ;;  %v512_v61 = vmul.f32 %v511_v57, %v1297_v29  ;;  %1033 = vmatprep.subr.msk.mxu0 %vm438_vm1, %v1184_v21  ;;  %1025 = vmatmul.mubr.msk.f32.vlgmr.msra.gmra.mxu0 %vm150_vm7, %v1318_v59  ;;  %v518_v0 = vmul.f32 %v517_v58, %v1299_v30 }
 0x12b   :  { %1034 = vmatpush1.msk.msra.mxu0 %vm438_vm1, %v1184_v21  ;;  %885 = vmatprep.mubr.f32.mxu0 %v1181_v1  ;;  %v524_v4 = vmul.f32 %v523_v62, %v1304_v35 }
 0x12c   :  { %v513_v63 = vadd.f32 %v512_v61, %v507_v60 }
 0x12e   :  { %v519_v3 = vadd.f32 %v518_v0, %v513_v63 }
 0x130   :  { %v525_v9 = vadd.f32 %v524_v4, %v519_v3 }
 0x132   :  { %v526_v11 = vadd.f32 %v525_v9, %v291_v10 }
 0x134   :  { %1057 = vtanh.f32 %v526_v11  ;;  %v433_v11 = vpop.f32.mrf.mxu1 }
 0x141   :  { %v1058_v12 = vpop.eup %1057 }
 0x142   :  { %v532_v13 = vrot.slane %v1058_v12, %v1233_v6  ;;  %v537_v14 = vrot.slane %v1058_v12, %v1230_v5  ;;  %v543_v15 = vrot.slane %v1058_v12, %v1239_v8  ;;  %v549_v18 = vrot.slane %v1058_v12, %v1236_v7 }
 0x144   :  { %v533_v16 = vmul.f32 %v532_v13, %v1295_v28  ;;  %v538_v17 = vmul.f32 %v537_v14, %v1297_v29  ;;  %v544_v20 = vmul.f32 %v543_v15, %v1299_v30  ;;  %v550_v23 = vmul.f32 %v549_v18, %v1304_v35 }
 0x146   :  { %v539_v19 = vadd.f32 %v538_v17, %v533_v16 }
 0x148   :  { %v545_v22 = vadd.f32 %v544_v20, %v539_v19 }
 0x14a   :  { %v551_v24 = vadd.f32 %v550_v23, %v545_v22 }
 0x14c   :  { %v552_v26 = vadd.f32 %v551_v24, %v293_v25 }
 0x14e   :  { %1059 = vtanh.f32 %v552_v26  ;;  %v435_v26 = vpop.f32.mrf.mxu1 }
 0x15b   :  { %v1060_v27 = vpop.eup %1059 }
 0x15c   :  { %780 = vmatprep.subr.mxu1 %v1060_v27  ;;  %v558_v31 = vrot.slane %v1060_v27, %v1233_v6  ;;  %v563_v32 = vrot.slane %v1060_v27, %v1230_v5  ;;  %v569_v33 = vrot.slane %v1060_v27, %v1239_v8  ;;  %v575_v37 = vrot.slane %v1060_v27, %v1236_v7 }
 0x15d   :  { %781 = vmatpush1.msra.mxu1 %v1058_v12 }
 0x15e   :  { %v559_v34 = vmul.f32 %v558_v31, %v1295_v28  ;;  %v564_v36 = vmul.f32 %v563_v32, %v1297_v29  ;;  %1026 = vmatmul.mubr.msk.f32.vlgmr.msra.gmra.mxu1 %vm150_vm7, %v1318_v59  ;;  %1035 = vmatprep.subr.msk.mxu1 %vm438_vm1, %v1184_v21  ;;  %v570_v39 = vmul.f32 %v569_v33, %v1299_v30 }
 0x15f   :  { %956 = vmatprep.mubr.f32.mxu1 %v1181_v1  ;;  %1036 = vmatpush1.msk.msra.mxu1 %vm438_vm1, %v1184_v21  ;;  %v576_v41 = vmul.f32 %v575_v37, %v1304_v35 }
 0x160   :  { %v565_v38 = vadd.f32 %v564_v36, %v559_v34 }
 0x162   :  { %v571_v40 = vadd.f32 %v570_v39, %v565_v38 }
 0x164   :  { %v577_v42 = vadd.f32 %v576_v41, %v571_v40 }
 0x166   :  { %v578_v44 = vadd.f32 %v577_v42, %v362_v43 }
 0x168   :  { %1061 = vtanh.f32 %v578_v44 }
 0x175   :  { %v1062_v45 = vpop.eup %1061 }
 0x176   :  { %v584_v46 = vrot.slane %v1062_v45, %v1233_v6  ;;  %v589_v47 = vrot.slane %v1062_v45, %v1230_v5  ;;  %v595_v1 = vrot.slane %v1062_v45, %v1239_v8  ;;  %v601_v2 = vrot.slane %v1062_v45, %v1236_v7 }
 0x178   :  { %v585_v48 = vmul.f32 %v584_v46, %v1295_v28  ;;  %v590_v49 = vmul.f32 %v589_v47, %v1297_v29  ;;  %v596_v50 = vmul.f32 %v595_v1, %v1299_v30  ;;  %v602_v52 = vmul.f32 %v601_v2, %v1304_v35 }
 0x17a   :  { %v591_v21 = vadd.f32 %v590_v49, %v585_v48 }
 0x17c   :  { %v597_v51 = vadd.f32 %v596_v50, %v591_v21 }
 0x17e   :  { %v603_v53 = vadd.f32 %v602_v52, %v597_v51 }
 0x180   :  { %v604_v55 = vadd.f32 %v603_v53, %v364_v54 }
 0x182   :  { %1063 = vtanh.f32 %v604_v55 }
 0x18f   :  { %v1064_v56 = vpop.eup %1063 }
 0x190   :  { %851 = vmatprep.subr.mxu0 %v1064_v56  ;;  %v610_v57 = vrot.slane %v1064_v56, %v1233_v6  ;;  %v615_v58 = vrot.slane %v1064_v56, %v1230_v5  ;;  %v621_v60 = vrot.slane %v1064_v56, %v1239_v8  ;;  %v627_v63 = vrot.slane %v1064_v56, %v1236_v7 }
 0x191   :  { %852 = vmatpush1.msra.mxu0 %v1062_v45 }
 0x192   :  { %v611_v61 = vmul.f32 %v610_v57, %v1295_v28  ;;  %v616_v62 = vmul.f32 %v615_v58, %v1297_v29  ;;  %1027 = vmatmul.mubr.msk.f32.vlgmr.msra.gmra.mxu0 %vm150_vm7, %v1318_v59  ;;  %v622_v3 = vmul.f32 %v621_v60, %v1299_v30  ;;  %v628_v9 = vmul.f32 %v627_v63, %v1304_v35 }
 0x194   :  { %v617_v0 = vadd.f32 %v616_v62, %v611_v61 }
 0x196   :  { %v623_v4 = vadd.f32 %v622_v3, %v617_v0 }
 0x198   :  { %v629_v10 = vadd.f32 %v628_v9, %v623_v4 }
 0x19a   :  { %v630_v12 = vadd.f32 %v629_v10, %v433_v11 }
 0x19c   :  { %1065 = vtanh.f32 %v630_v12 }
 0x1a9   :  { %v1066_v13 = vpop.eup %1065 }
 0x1aa   :  { %v636_v14 = vrot.slane %v1066_v13, %v1233_v6  ;;  %v641_v15 = vrot.slane %v1066_v13, %v1230_v5  ;;  %v647_v16 = vrot.slane %v1066_v13, %v1239_v8  ;;  %v653_v19 = vrot.slane %v1066_v13, %v1236_v7 }
 0x1ac   :  { %v637_v17 = vmul.f32 %v636_v14, %v1295_v28  ;;  %v642_v18 = vmul.f32 %v641_v15, %v1297_v29  ;;  %v648_v22 = vmul.f32 %v647_v16, %v1299_v30  ;;  %v654_v24 = vmul.f32 %v653_v19, %v1304_v35 }
 0x1ae   :  { %v643_v20 = vadd.f32 %v642_v18, %v637_v17 }
 0x1b0   :  { %v649_v23 = vadd.f32 %v648_v22, %v643_v20 }
 0x1b2   :  { %v655_v25 = vadd.f32 %v654_v24, %v649_v23 }
 0x1b4   :  { %v656_v27 = vadd.f32 %v655_v25, %v435_v26 }
 0x1b6   :  { %1067 = vtanh.f32 %v656_v27 }
 0x1c3   :  { %v1068_v6 = vpop.eup %1067 }
 0x1c4   :  { %922 = vmatprep.subr.mxu1 %v1068_v6 }
 0x1c5   :  { %923 = vmatpush1.msra.mxu1 %v1066_v13 }
 0x1c6   :  { %1028 = vmatmul.mubr.msk.f32.vlgmr.msra.gmra.mxu1 %vm150_vm7, %v1318_v59 }
 0x1ea   :  { %v745_v5 = vpop.f32.mrf.mxu0 }
 0x1eb   :  { %963 = vst [vmem:[#allocation11] sm:$0xff] %v745_v5 }
 0x1ec   :  { %v747_v8 = vpop.f32.mrf.mxu0 }
 0x1ed   :  { %964 = vst [vmem:[#allocation11 + $0x8] sm:$0xff] %v747_v8 }
 0x21e   :  { %v816_v7 = vpop.f32.mrf.mxu1 }
 0x21f   :  { %965 = vst [vmem:[#allocation11 + $0x10] sm:$0xff] %v816_v7 }
 0x220   :  { %v818_v28 = vpop.f32.mrf.mxu1 }
 0x221   :  { %966 = vst [vmem:[#allocation11 + $0x18] sm:$0xff] %v818_v28 }
 0x252   :  { %v887_v29 = vpop.f32.mrf.mxu0 }
 0x253   :  { %967 = vst [vmem:[#allocation11 + $0x20] sm:$0xff] %v887_v29 }
 0x254   :  { %v889_v30 = vpop.f32.mrf.mxu0 }
 0x255   :  { %968 = vst [vmem:[#allocation11 + $0x28] sm:$0xff] %v889_v30 }
 0x286   :  { %v958_v35 = vpop.f32.mrf.mxu1 }
 0x287   :  { %969 = vst [vmem:[#allocation11 + $0x30] sm:$0xff] %v958_v35 }
 0x288   :  { %v960_v31 = vpop.f32.mrf.mxu1 }
 0x289   :  { %970 = vst [vmem:[#allocation11 + $0x38] sm:$0xff] %v960_v31 }
 0x28a   :  { %1160 = shalt.err (!%p1157_p10)
}
 0x28b   :  { %980 = dma.vmem_to_hbm [thread:$0]  %s978_s3, 1024, %s1394_s4, [#allocation5]  }
 0x28c   :  { %1175 = dma.done.wait [#allocation5], 1024  }
 0x28d   :  { %1176 = vsyncadd [#allocation5], 4294966272 }
 0x28e   :  { %984 = vsyncpa [#allocation4], 1 }
 0x28f   :  { %985 = vsyncpa [#allocation7], 1 }
 0x290   :  { %986 = vsyncpa [#allocation10], 1 }
 0x291   :  { %987 = vsyncpa [#allocation5], 1 }

</bundles_post_ra>
